<compile_context>
chip_gen: v7x
topology: tpu7x:2x2x1
jax: 0.10.0
libtpu: 0.0.40
codegen_flags: <defaults>
</compile_context>

<pallas_src>
import functools

import jax
import jax.numpy as jnp
import numpy as np
from jax import lax
from jax.experimental import pallas as pl
from jax.experimental.pallas import tpu as pltpu


# ---------------------------------------------------------------------------
# pltpu.roll direction probe (robust to roll convention across jax versions).
# Returns True if pltpu.roll follows np.roll semantics: out[i] = in[i - shift].
# ---------------------------------------------------------------------------
_ROLL_NP = None


def _roll_is_np_convention():
    global _ROLL_NP
    if _ROLL_NP is None:
        def k(x_ref, o_ref):
            o_ref[...] = pltpu.roll(x_ref[...], 1, axis=1)

        x = jnp.tile(jnp.arange(128, dtype=jnp.float32)[None, :], (8, 1))
        out = pl.pallas_call(
            k, out_shape=jax.ShapeDtypeStruct((8, 128), jnp.float32))(x)
        _ROLL_NP = bool(float(out[0, 0]) == 127.0)
    return _ROLL_NP


# ---------------------------------------------------------------------------
# Shared in-kernel helper: build the im2col slab in VMEM.
#   x    : (Cin_p, Ng)   image, channels on sublanes, H*W on lanes
#   m_ref: (U, Ng)       validity mask per distinct spatial shift
#   ->     (U*Cin_p, Ng) shifted+masked copies stacked along sublanes
# (Cin_p is padded to a multiple of 8, so the concat is tile aligned.)
# ---------------------------------------------------------------------------
def _build_rhs(x, m_ref, roll_amts):
    slabs = []
    for u, r in enumerate(roll_amts):              # static Python loop, U <= K*K
        xs = pltpu.roll(x, r, axis=1) if r else x  # XLU lane rotation
        slabs.append(xs * m_ref[u:u + 1, :])
    return jnp.concatenate(slabs, axis=0)


# ---------------------------------------------------------------------------
# Kernel 1: transposed conv (phase decomposed, one MXU matmul per image) ->
#           per-image BatchNorm sums only.  y is NOT written to HBM.
# ---------------------------------------------------------------------------
def _stats_kernel(x_ref, w_ref, m_ref, st_ref, *, roll_amts, compute_dtype):
    """x_ref: (1, Cin_p, Ng)  w_ref: (P*Cout, U*Cin_p)  m_ref: (U, Ng)
    st_ref: (1, P*Cout, 2) -> [sum, sum of squares] per (phase, out-channel)."""
    rhs = _build_rhs(x_ref[0], m_ref, roll_amts)             # (U*Cin_p, Ng)
    y = jnp.dot(w_ref[...].astype(compute_dtype), rhs.astype(compute_dtype),
                preferred_element_type=jnp.float32)          # (P*Cout, Ng)
    st_ref[0] = jnp.concatenate(
        [jnp.sum(y, axis=1, keepdims=True),
         jnp.sum(y * y, axis=1, keepdims=True)], axis=1)     # single small store


# ---------------------------------------------------------------------------
# Kernel 2: transposed conv recomputed + folded BN affine + ReLU.
#           scale/shift already fold gamma, beta, mean, var, eps (host-side).
# ---------------------------------------------------------------------------
def _deconv_bn_relu_kernel(x_ref, w_ref, m_ref, sc_ref, sh_ref, o_ref, *,
                           roll_amts, compute_dtype, apply_relu):
    rhs = _build_rhs(x_ref[0], m_ref, roll_amts)             # (U*Cin_p, Ng)
    y = jnp.dot(w_ref[...].astype(compute_dtype), rhs.astype(compute_dtype),
                preferred_element_type=jnp.float32)          # (P*Cout, Ng)
    out = y * sc_ref[...] + sh_ref[...]                      # (P*Cout,1) bcast
    if apply_relu:
        out = jnp.maximum(out, 0.0)
    o_ref[0] = out                                           # lane-dense store


class Deconv2dPallas:
    """JAX/Pallas version of the PyTorch `Deconv2d` (defaults: bn=True,
    relu=True, hence ConvTranspose2d has no bias)."""

    def __init__(self, in_channels, out_channels, kernel_size, stride=1,
                 relu=True, bn=True, padding=0, eps=1e-5, seed=0,
                 compute_dtype=jnp.float32):
        assert stride in (1, 2)
        assert bn, "only the default bn=True path is implemented"
        # TODO(synk): bn=False in the reference module returns relu(input) due
        # to a reference-code quirk; not reproduced here.
        assert 0 <= padding <= kernel_size - 1, \
            "need 0 <= padding <= K-1 (output_padding not supported)"
        if stride == 2:
            assert kernel_size >= 2 + 2 * padding, \
                "stride-2 path assumes the PyTorch crop lands exactly at 2H x 2W"
        else:
            assert 2 * padding <= kernel_size - 1

        self.Cin, self.Cout, self.K = in_channels, out_channels, kernel_size
        self.stride, self.padding = stride, padding
        self.relu, self.eps = relu, eps
        # Set to jnp.bfloat16 on v6e/v7x for ~2x MXU throughput (re-validate
        # tolerances); f32 by default so the self-check stays tight.
        self.compute_dtype = compute_dtype

        # Deterministic xavier-uniform init of the ConvTranspose2d weight,
        # torch shape (Cin, Cout, K, K).
        fan_in = out_channels * kernel_size * kernel_size
        fan_out = in_channels * kernel_size * kernel_size
        bound = float(np.sqrt(6.0 / (fan_in + fan_out)))
        self.w_t = jax.random.uniform(
            jax.random.PRNGKey(seed),
            (in_channels, out_channels, kernel_size, kernel_size),
            jnp.float32, -bound, bound)

        # BatchNorm2d params (init_bn: weight = 1, bias = 0).
        self.gamma = jnp.ones((out_channels,), jnp.float32)
        self.beta = jnp.zeros((out_channels,), jnp.float32)

        # --- sub-pixel (phase) decomposition of the transposed convolution ---
        # y[s*qh+rh, s*qw+rw, co] = sum_taps x[qh+dh, qw+dw, ci] * w_flip[kh,kw,ci,co]
        s, K, p = stride, kernel_size, padding
        pad = K - 1 - p
        w_flip = np.transpose(np.asarray(self.w_t)[:, :, ::-1, ::-1],
                              (2, 3, 0, 1))                      # (K,K,Cin,Cout)
        self.P = s * s
        self.Cin_p = ((in_channels + 7) // 8) * 8   # sublane-aligned channel block

        shifts, shift_idx, entries = [], {}, []
        for rh in range(s):
            for rw in range(s):
                ph = rh * s + rw
                for kh in range(K):
                    if (kh - (pad - rh)) % s:
                        continue
                    dh = (rh + kh - pad) // s
                    for kw in range(K):
                        if (kw - (pad - rw)) % s:
                            continue
                        dw = (rw + kw - pad) // s
                        if (dh, dw) not in shift_idx:
                            shift_idx[(dh, dw)] = len(shifts)
                            shifts.append((dh, dw))
                        entries.append((ph, shift_idx[(dh, dw)], kh, kw))
        self.shifts = shifts
        U = len(shifts)

        # Block weight: one big LHS so the whole image is ONE matmul.
        w_blk = np.zeros((self.P * out_channels, U * self.Cin_p), np.float32)
        for ph, u, kh, kw in entries:
            w_blk[ph * out_channels:(ph + 1) * out_channels,
                  u * self.Cin_p:u * self.Cin_p + in_channels] += w_flip[kh, kw].T
        self.w_blk = jnp.asarray(w_blk)

        self._np_roll = _roll_is_np_convention()

    def __call__(self, x_nchw):
        N, Cin, H, W = x_nchw.shape
        assert Cin == self.Cin
        s, K, p, Cout = self.stride, self.K, self.padding, self.Cout
        P, Cin_p, U = self.P, self.Cin_p, len(self.shifts)

        if s == 2:
            Hg, Wg = H, W                    # per-phase (already cropped) grid
            Hc, Wc = 2 * H, 2 * W
        else:
            Hg = H + K - 1 - 2 * p           # = H_out
            Wg = W + K - 1 - 2 * p
            Hc, Wc = Hg, Wg
        Ng = Hg * Wg
        PCout = P * Cout

        # --- cheap host glue: channel pad to a sublane multiple, flatten H*W on lanes ---
        x = x_nchw.astype(jnp.float32)
        if Cin_p != Cin:
            x = jnp.pad(x, ((0, 0), (0, Cin_p - Cin), (0, 0), (0, 0)))
        if s == 1 and (Hg != H or Wg != W):
            x = jnp.pad(x, ((0, 0), (0, 0), (0, Hg - H), (0, Wg - W)))
        x_flat = x.reshape(N, Cin_p, Ng)

        # Per-shift validity masks + lane-roll amounts (static, tiny).
        ii = np.arange(Ng)
        qh, qw = ii // Wg, ii % Wg
        mask = np.stack(
            [((qh + dh >= 0) & (qh + dh < H) &
              (qw + dw >= 0) & (qw + dw < W)).astype(np.float32)
             for dh, dw in self.shifts], axis=0)                    # (U, Ng)
        mask = jnp.asarray(mask)
        roll_amts = tuple(
            ((-(dh * Wg + dw)) % Ng) if self._np_roll else ((dh * Wg + dw) % Ng)
            for dh, dw in self.shifts)

        cparams = pltpu.CompilerParams(
            dimension_semantics=("parallel",),
            vmem_limit_bytes=32 * 1024 * 1024)

        # --- pass 1: transposed conv -> per-image BN sums only (y stays in VMEM) ---
        stats = pl.pallas_call(
            functools.partial(_stats_kernel, roll_amts=roll_amts,
                              compute_dtype=self.compute_dtype),
            out_shape=jax.ShapeDtypeStruct((N, PCout, 2), jnp.float32),
            grid=(N,),
            in_specs=[
                pl.BlockSpec((1, Cin_p, Ng), lambda n: (n, 0, 0)),
                pl.BlockSpec((PCout, U * Cin_p), lambda n: (0, 0)),
                pl.BlockSpec((U, Ng), lambda n: (0, 0)),
            ],
            out_specs=pl.BlockSpec((1, PCout, 2), lambda n: (n, 0, 0)),
            compiler_params=cparams,
        )(x_flat, self.w_blk, mask)

        # --- tiny host-side reduction of the fused stats -> per-channel affine ---
        cnt = float(N * P * Ng)              # == N * Hc * Wc
        s1 = jnp.sum(stats[:, :, 0].reshape(N, P, Cout), axis=(0, 1))
        s2 = jnp.sum(stats[:, :, 1].reshape(N, P, Cout), axis=(0, 1))
        mean = s1 / cnt
        var = s2 / cnt - mean * mean         # biased variance (training-mode BN)
        scale_c = self.gamma * lax.rsqrt(var + self.eps)
        shift_c = self.beta - mean * scale_c
        scale = jnp.tile(scale_c, P).reshape(PCout, 1)
        shift = jnp.tile(shift_c, P).reshape(PCout, 1)

        # --- pass 2: conv recomputed + folded BN + ReLU, one lane-dense write ---
        out_ph = pl.pallas_call(
            functools.partial(_deconv_bn_relu_kernel, roll_amts=roll_amts,
                              compute_dtype=self.compute_dtype,
                              apply_relu=self.relu),
            out_shape=jax.ShapeDtypeStruct((N, PCout, Ng), jnp.float32),
            grid=(N,),
            in_specs=[
                pl.BlockSpec((1, Cin_p, Ng), lambda n: (n, 0, 0)),
                pl.BlockSpec((PCout, U * Cin_p), lambda n: (0, 0)),
                pl.BlockSpec((U, Ng), lambda n: (0, 0)),
                pl.BlockSpec((PCout, 1), lambda n: (0, 0)),
                pl.BlockSpec((PCout, 1), lambda n: (0, 0)),
            ],
            out_specs=pl.BlockSpec((1, PCout, Ng), lambda n: (n, 0, 0)),
            compiler_params=cparams,
        )(x_flat, self.w_blk, mask, scale, shift)

        # --- free reshape back to NCHW (s=1) / pixel un-shuffle of phases (s=2) ---
        if s == 1:
            return out_ph.reshape(N, Cout, Hc, Wc)
        out = out_ph.reshape(N, s, s, Cout, Hg, Wg)
        out = jnp.transpose(out, (0, 3, 4, 1, 5, 2))     # (N,Cout,H,s,W,s)
        return out.reshape(N, Cout, Hc, Wc)


def _reference(mod, x_nchw):
    """Pure-JAX reference (lax.conv with lhs_dilation == conv_transpose)."""
    s, K, p = mod.stride, mod.K, mod.padding
    N, Cin, H, W = x_nchw.shape
    w_conv = jnp.transpose(mod.w_t[:, :, ::-1, ::-1], (1, 0, 2, 3))  # OIHW
    y = lax.conv_general_dilated(
        x_nchw.astype(jnp.float32), w_conv, window_strides=(1, 1),
        padding=[(K - 1 - p, K - 1 - p)] * 2, lhs_dilation=(s, s),
        dimension_numbers=('NCHW', 'OIHW', 'NCHW'))
    if s == 2:
        y = y[:, :, :2 * H, :2 * W]
    mean = jnp.mean(y, axis=(0, 2, 3), keepdims=True)
    var = jnp.mean((y - mean) ** 2, axis=(0, 2, 3), keepdims=True)
    out = (y - mean) * lax.rsqrt(var + mod.eps)
    out = out * mod.gamma.reshape(1, -1, 1, 1) + mod.beta.reshape(1, -1, 1, 1)
    if mod.relu:
        out = jnp.maximum(out, 0.0)
    return out


if __name__ == "__main__":
    key = jax.random.PRNGKey(0)
    # NCHW input, like the PyTorch module.
    x = jax.random.normal(key, (2, 4, 16, 16), dtype=jnp.float32)

    mod = Deconv2dPallas(in_channels=4, out_channels=8, kernel_size=3,
                         stride=2, relu=True, bn=True)

    out = jax.block_until_ready(mod(x))
    assert out.shape == (2, 8, 32, 32), out.shape

    ref = _reference(mod, x)
    np.testing.assert_allclose(np.asarray(out), np.asarray(ref),
                               rtol=2e-3, atol=2e-3)
    print("KERNEL_OK")
</pallas_src>

<mosaic_0001>
module attributes {stable_mosaic.version = 11 : i64} {
  func.func @k(%arg0: memref<8x128xf32, #tpu.memory_space<vmem>>, %arg1: memref<8x128xf32, #tpu.memory_space<vmem>>) attributes {dimension_semantics = [], scalar_prefetch = 0 : i64, scratch_operands = 0 : i64, tpu.core_type = #tpu.core_type<tc>} {
    %c0 = arith.constant 0 : index
    %c0_0 = arith.constant 0 : index
    %0 = vector.load %arg0[%c0, %c0_0] : memref<8x128xf32, #tpu.memory_space<vmem>>, vector<8x128xf32>
    %c1_i32 = arith.constant 1 : i32
    %1 = tpu.dynamic_rotate %0 by %c1_i32 dim 1 : vector<8x128xf32>, i32 -> vector<8x128xf32>
    %c0_1 = arith.constant 0 : index
    %c0_2 = arith.constant 0 : index
    %2 = vector.load %arg1[%c0_1, %c0_2] : memref<8x128xf32, #tpu.memory_space<vmem>>, vector<8x128xf32>
    tpu.vector_store %arg1[%c0_1, %c0_2], %1 {strides = array<i32>} : memref<8x128xf32, #tpu.memory_space<vmem>>, vector<8x128xf32>,
    return
  }
}

</mosaic_0001>

<bundles_post_ra>
// kernel: tpu_custom_call.1
= control target key start
LH: loop header
LB: loop body
LE: loop exit
PB: predicated region body
PF: predicated region fallthrough
CT: control target
= control target key end

     0   :  { %6 = vsyncpa [#allocation3], 0  ;;  %s128_s0 = inlined_call_operand.hbm [shape: f32[8,128], index: 0, kind: input, shape index: {}]   ;;  %s129_s1 = inlined_call_operand.hbm [shape: f32[8,128], index: 1, kind: output, shape index: {}]  }
   0x1   :  { %7 = vsyncpa [#allocation4], 0  ;;  %s91_s6 = smov [#allocation2]   ;;  %s43_s10 = scalar_lea.hbm %s128_s0, 128 }
   0x2   :  { %s14_s7 = sshll.u32 %s91_s6, 4  ;;  %p44_p0 = scmp.ne.s32.totalorder %s128_s0, %s43_s10  ;;  %s15_s7 = int_to_ptr.vmem [resolvable:$true] %s14_s7 }
   0x3   :  { %p47_p1 = scmp.lt.u32.totalorder %s43_s10, %s128_s0 }
   0x5   :  { %p49_p2 = pnand %p47_p1, %p44_p0 }
   0x7   :  { %52 = shalt.err (!%p49_p2)
}
   0x8   :  { %s53_s15 = scalar_lea.vmem %s15_s7, 128  ;;  %p58_p4 = scmp.lt.s32.totalorder %s15_s7, %s15_s7 }
   0x9   :  { %p54_p3 = scmp.ne.s32.totalorder %s15_s7, %s53_s15  ;;  %p59_p5 = scmp.lt.s32.totalorder %s53_s15, %s53_s15 }
   0xb   :  { %p60_p6 = por %p59_p5, %p58_p4 }
   0xd   :  { %p61_p7 = pnand %p60_p6, %p54_p3 }
   0xf   :  { %64 = shalt.err (!%p61_p7)
}
  0x10   :  { %17 = dma.hbm_to_vmem [thread:$0]  %s128_s0, 128, %s15_s7, [#allocation3]  }
  0x11   :  { %87 = dma.done.wait [#allocation3], 128  }
  0x12   :  { %88 = vsyncadd [#allocation3], 4294967168  ;;  %v21_v0 = vld [vmem:[#allocation2] sm:$0xff]  ;;  %s92_s18 = smov 1   ;;  %s93_s19 = smov [#allocation5]  }
  0x13   :  { %22 = vrot.lane.b32.xlu0 %v21_v0, %s92_s18  ;;  %s31_s20 = sshll.u32 %s93_s19, 4  ;;  %s32_s20 = int_to_ptr.vmem [resolvable:$true] %s31_s20 }
  0x14   :  { %s65_s21 = scalar_lea.vmem %s32_s20, 128  ;;  %p70_p9 = scmp.lt.s32.totalorder %s32_s20, %s32_s20 }
  0x15   :  { %p66_p8 = scmp.ne.s32.totalorder %s32_s20, %s65_s21  ;;  %p71_p10 = scmp.lt.s32.totalorder %s65_s21, %s65_s21 }
  0x17   :  { %p72_p11 = por %p71_p10, %p70_p9 }
  0x19   :  { %p73_p12 = pnand %p72_p11, %p66_p8 }
  0x85   :  { %v23_v1 = vpop.permute.xlu0 %22 }
  0x86   :  { %24 = vst [vmem:[#allocation5] sm:$0xff] %v23_v1 }
  0x87   :  { %76 = shalt.err (!%p73_p12)
}
  0x88   :  { %s77_s0 = scalar_lea.hbm %s129_s1, 128 }
  0x89   :  { %p78_p13 = scmp.ne.s32.totalorder %s129_s1, %s77_s0  ;;  %p81_p0 = scmp.lt.u32.totalorder %s77_s0, %s129_s1 }
  0x8b   :  { %p83_p1 = pnand %p81_p0, %p78_p13 }
  0x8d   :  { %86 = shalt.err (!%p83_p1)
}
  0x8e   :  { %34 = dma.vmem_to_hbm [thread:$0]  %s32_s20, 128, %s129_s1, [#allocation4]  }
  0x8f   :  { %89 = dma.done.wait [#allocation4], 128  }
  0x90   :  { %90 = vsyncadd [#allocation4], 4294967168 }
  0x91   :  { %38 = vsyncpa [#allocation3], 1 }
  0x92   :  { %39 = vsyncpa [#allocation4], 1 }

</bundles_post_ra>
